<compile_context>
chip_gen: v7x
topology: tpu7x:2x2x1
jax: 0.10.0
libtpu: 0.0.40
codegen_flags: <defaults>
</compile_context>

<pallas_src>
import numpy as np
import jax
import jax.numpy as jnp
from jax.experimental import pallas as pl
from jax.experimental.pallas import tpu as pltpu

_LANES = 128     # lane width of every vreg row; table replica width
_T_CHUNK = 32    # table rows processed per loop step -> (32, 128) = 4 f32 vregs


# ----------------------------------------------------------------------------
# Schedule construction (pure numpy glue — identical math to the PyTorch code)
# Runs once at module init; not a kernel.
# ----------------------------------------------------------------------------
def cosine_beta_schedule(timesteps, s=0.008, raise_to_power: float = 1):
    steps = timesteps + 2
    x = np.linspace(0, steps, steps)
    alphas_cumprod = np.cos((x / steps + s) / (1 + s) * np.pi * 0.5) ** 2
    alphas_cumprod = alphas_cumprod / alphas_cumprod[0]
    betas = 1 - alphas_cumprod[1:] / alphas_cumprod[:-1]
    betas = np.clip(betas, a_min=0, a_max=0.999)
    alphas = 1.0 - betas
    alphas_cumprod = np.cumprod(alphas, axis=0)
    if raise_to_power != 1:
        alphas_cumprod = np.power(alphas_cumprod, raise_to_power)
    return alphas_cumprod


def clip_noise_schedule(alphas2, clip_value=0.001):
    alphas2 = np.concatenate([np.ones(1), alphas2], axis=0)
    alphas_step = alphas2[1:] / alphas2[:-1]
    alphas_step = np.clip(alphas_step, a_min=clip_value, a_max=1.0)
    alphas2 = np.cumprod(alphas_step, axis=0)
    return alphas2


def polynomial_schedule(timesteps: int, s=0.0001, power=3.0):
    steps = timesteps + 1
    x = np.linspace(0, steps, steps)
    alphas2 = (1 - np.power(x / steps, power)) ** 2
    alphas2 = clip_noise_schedule(alphas2, clip_value=0.001)
    precision = 1 - 2 * s
    alphas2 = precision * alphas2 + s
    return alphas2


def build_gamma_table(noise_schedule: str, timesteps: int, precision: float) -> np.ndarray:
    if noise_schedule == "cosine":
        alphas2 = cosine_beta_schedule(timesteps)
    elif "polynomial" in noise_schedule:
        splits = noise_schedule.split("_")
        assert len(splits) == 2
        power = float(splits[1])
        alphas2 = polynomial_schedule(timesteps, s=precision, power=power)
    else:
        raise ValueError(noise_schedule)
    sigmas2 = 1 - alphas2
    log_alphas2 = np.log(alphas2)
    log_sigmas2 = np.log(sigmas2)
    log_alphas2_to_sigmas2 = log_alphas2 - log_sigmas2
    gamma = (-log_alphas2_to_sigmas2).astype(np.float32)   # shape (timesteps + 1,)
    return gamma


def init_predefined_noise_schedule(noise_schedule: str, timesteps: int, precision: float):
    """Build the gamma table once, pre-padded + lane-replicated for the kernel.

    Returns (gamma_table [T_pad, 128] f32 device array, raw gamma [T+1] f32).
    T_pad is a multiple of _T_CHUNK; padded rows are exactly 0 (never selected
    because the kernel clamps t_int to [0, timesteps]).
    """
    gamma = build_gamma_table(noise_schedule, timesteps, precision)   # (T+1,)
    t_len = gamma.shape[0]
    t_pad = ((t_len + _T_CHUNK - 1) // _T_CHUNK) * _T_CHUNK
    table = np.zeros((t_pad, _LANES), dtype=np.float32)
    table[:t_len, :] = gamma[:, None]          # replicate across all 128 lanes
    return jnp.asarray(table), jnp.asarray(gamma)


# ----------------------------------------------------------------------------
# Pallas kernel: round + clamp + chunked compare/select gather, single grid step
# ----------------------------------------------------------------------------
def _make_gamma_lookup_kernel(timesteps: int, n_rows: int, n_chunks: int, unroll):
    def kernel(t_ref, gamma_ref, out_ref):
        # t_ref:     (n_rows, 1, 128) f32   normalized times, one 128-lane row per step
        # gamma_ref: (T_pad, 128)     f32   lane-replicated gamma table (resident)
        # out_ref:   (n_rows, 1, 128) f32
        # Hoisted once: sublane iota for a single table chunk.
        chunk_iota = jax.lax.broadcasted_iota(jnp.int32, (_T_CHUNK, _LANES), 0)

        @pl.loop(0, n_rows)
        def _(r):
            t_row = t_ref[r]                                           # (1, 128) f32
            # torch.round / jnp.round both round half-to-even.
            t_int = jnp.round(t_row * float(timesteps)).astype(jnp.int32)
            # Clamp so out-of-range t hits an edge gamma value, never the zero
            # pad.  (Intentional divergence from PyTorch for t < 0, which would
            # wrap to gamma[-1].)
            t_int = jnp.clip(t_int, 0, timesteps)                      # (1, 128)

            def body(c, acc):
                base = pl.multiple_of(c * _T_CHUNK, _T_CHUNK)          # sublane-aligned
                tbl = gamma_ref[pl.ds(base, _T_CHUNK), :]              # (32, 128) f32
                match = chunk_iota == (t_int - base)                   # (32, 128) bool
                return jnp.where(match, tbl, acc)                      # select-into-acc

            acc = jax.lax.fori_loop(
                0, n_chunks, body,
                jnp.zeros((_T_CHUNK, _LANES), jnp.float32), unroll=unroll)
            # Exactly one sublane per lane holds the gamma value -> one reduce.
            out_ref[r] = jnp.sum(acc, axis=0, keepdims=True)           # (1, 128)

    return kernel


def predefined_noise_schedule_forward(t: jax.Array, gamma_table: jax.Array,
                                      timesteps: int) -> jax.Array:
    """t: arbitrary-shaped float array of normalized times in [0, 1].

    Returns gamma[round(t * timesteps)], same shape as t (float32).
    """
    orig_shape = t.shape
    t_flat = jnp.ravel(t).astype(jnp.float32)
    b = t_flat.shape[0]

    n_rows = max(1, (b + _LANES - 1) // _LANES)
    b_pad = n_rows * _LANES
    t_blk = jnp.pad(t_flat, (0, b_pad - b)).reshape(n_rows, 1, _LANES)

    t_pad_len = gamma_table.shape[0]
    assert t_pad_len % _T_CHUNK == 0 and gamma_table.shape[1] == _LANES
    n_chunks = t_pad_len // _T_CHUNK
    unroll = n_chunks if n_chunks <= 4 else 4

    kernel = _make_gamma_lookup_kernel(timesteps, n_rows, n_chunks, unroll)

    out = pl.pallas_call(
        kernel,
        out_shape=jax.ShapeDtypeStruct((n_rows, 1, _LANES), jnp.float32),
        grid=(1,),
        in_specs=[
            # Whole padded batch in one block (single grid step).
            pl.BlockSpec((n_rows, 1, _LANES), lambda i: (0, 0, 0)),
            # Whole gamma table resident in VMEM.
            pl.BlockSpec((t_pad_len, _LANES), lambda i: (0, 0)),
        ],
        out_specs=pl.BlockSpec((n_rows, 1, _LANES), lambda i: (0, 0, 0)),
        cost_estimate=pl.CostEstimate(
            flops=2 * b_pad * t_pad_len,          # compare + select per element pair
            transcendentals=0,
            bytes_accessed=4 * (2 * b_pad + t_pad_len * _LANES)),
    )(t_blk, gamma_table)

    return out.reshape(-1)[:b].reshape(orig_shape)


# ----------------------------------------------------------------------------
# Demo / self-check
# ----------------------------------------------------------------------------
if __name__ == "__main__":
    key = jax.random.PRNGKey(0)
    k1, k2 = jax.random.split(key)

    # --- small case, matching the module's typical use: t of shape (B, 1) ---
    timesteps = 16
    precision = 1e-5
    table, gamma_raw = init_predefined_noise_schedule("cosine", timesteps, precision)

    B = 8
    t = jax.random.uniform(k1, (B, 1), dtype=jnp.float32)    # t in [0, 1)
    out = predefined_noise_schedule_forward(t, table, timesteps)
    out = jax.block_until_ready(out)

    t_int_ref = jnp.round(t * timesteps).astype(jnp.int32)
    ref = gamma_raw[t_int_ref[:, 0]][:, None]
    assert out.shape == (B, 1)
    assert jnp.allclose(out, ref, atol=1e-6), (out, ref)

    # --- larger case: exercises the in-kernel row loop and the T chunking ---
    timesteps2 = 1000
    table2, gamma2_raw = init_predefined_noise_schedule("polynomial_2", timesteps2, precision)

    B2 = 600
    t2 = jax.random.uniform(k2, (B2, 1), dtype=jnp.float32)
    out2 = predefined_noise_schedule_forward(t2, table2, timesteps2)
    out2 = jax.block_until_ready(out2)

    t2_int_ref = jnp.round(t2 * timesteps2).astype(jnp.int32)
    ref2 = gamma2_raw[t2_int_ref[:, 0]][:, None]
    assert out2.shape == (B2, 1)
    assert jnp.allclose(out2, ref2, atol=1e-6)

    print("KERNEL_OK")
</pallas_src>

<mosaic_0001>
module attributes {stable_mosaic.version = 11 : i64} {
  func.func @kernel(%arg0: i32, %arg1: memref<1x1x128xf32, #tpu.memory_space<vmem>>, %arg2: memref<32x128xf32, #tpu.memory_space<vmem>>, %arg3: memref<1x1x128xf32, #tpu.memory_space<vmem>>) attributes {dimension_semantics = [#tpu.dimension_semantics<arbitrary>], iteration_bounds = array<i64: 1>, scalar_prefetch = 0 : i64, scratch_operands = 0 : i64, tpu.core_type = #tpu.core_type<tc>, window_params = [{pipeline_mode = #tpu.pipeline_mode<synchronous>, transform_indices = @transform_0, window_bounds = array<i64: 1, 1, 128>}, {pipeline_mode = #tpu.pipeline_mode<synchronous>, transform_indices = @transform_1, window_bounds = array<i64: 32, 128>}, {pipeline_mode = #tpu.pipeline_mode<synchronous>, transform_indices = @transform_2, window_bounds = array<i64: 1, 1, 128>}]} {
    %0 = tpu.iota {dimensions = array<i32: 0>} : vector<32x128xi32>
    %c0_i32 = arith.constant 0 : i32
    %c1_i32 = arith.constant 1 : i32
    %1 = arith.muli %c0_i32, %c1_i32 : i32
    %c0_i32_0 = arith.constant 0 : i32
    %2 = arith.addi %c0_i32_0, %1 : i32
    %3 = arith.index_cast %2 : i32 to index
    %c0 = arith.constant 0 : index
    %c0_1 = arith.constant 0 : index
    %4 = vector.load %arg1[%3, %c0, %c0_1] : memref<1x1x128xf32, #tpu.memory_space<vmem>>, vector<1x1x128xf32>
    %5 = vector.shape_cast %4 : vector<1x1x128xf32> to vector<1x128xf32>
    %cst = arith.constant 1.600000e+01 : f32
    %6 = vector.broadcast %cst : f32 to vector<1x128xf32>
    %7 = arith.mulf %5, %6 : vector<1x128xf32>
    %8 = math.roundeven %7 : vector<1x128xf32>
    %9 = arith.fptosi %8 : vector<1x128xf32> to vector<1x128xi32>
    %c0_i32_2 = arith.constant 0 : i32
    %c16_i32 = arith.constant 16 : i32
    %10 = vector.broadcast %c0_i32_2 : i32 to vector<1x128xi32>
    %11 = arith.maxsi %10, %9 : vector<1x128xi32>
    %12 = vector.broadcast %c16_i32 : i32 to vector<1x128xi32>
    %13 = arith.minsi %12, %11 : vector<1x128xi32>
    %cst_3 = arith.constant 0.000000e+00 : f32
    %14 = vector.broadcast %cst_3 : f32 to vector<32x128xf32>
    %c0_i32_4 = arith.constant 0 : i32
    %c32_i32 = arith.constant 32 : i32
    %15 = arith.muli %c0_i32_4, %c32_i32 : i32
    %16 = tpu.assume_multiple %15, 32 : i32
    %17 = arith.index_cast %16 : i32 to index
    %c0_5 = arith.constant 0 : index
    %18 = vector.load %arg2[%17, %c0_5] : memref<32x128xf32, #tpu.memory_space<vmem>>, vector<32x128xf32>
    %19 = vector.broadcast %16 : i32 to vector<1x128xi32>
    %20 = arith.subi %13, %19 : vector<1x128xi32>
    %21 = vector.broadcast %20 : vector<1x128xi32> to vector<32x128xi32>
    %22 = arith.cmpi eq, %0, %21 : vector<32x128xi32>
    %23 = arith.select %22, %18, %14 : vector<32x128xi1>, vector<32x128xf32>
    %c1_i32_6 = arith.constant 1 : i32
    %cst_7 = arith.constant dense<0.000000e+00> : vector<128xf32>
    %24 = vector.multi_reduction <add>, %23, %cst_7 [0] : vector<32x128xf32> to vector<128xf32>
    %25 = vector.shape_cast %24 : vector<128xf32> to vector<1x128xf32>
    %26 = arith.index_cast %2 : i32 to index
    %c0_8 = arith.constant 0 : index
    %c0_9 = arith.constant 0 : index
    %27 = vector.load %arg3[%26, %c0_8, %c0_9] : memref<1x1x128xf32, #tpu.memory_space<vmem>>, vector<1x1x128xf32>
    %28 = vector.shape_cast %27 : vector<1x1x128xf32> to vector<1x128xf32>
    %29 = vector.shape_cast %25 : vector<1x128xf32> to vector<1x1x128xf32>
    tpu.vector_store %arg3[%26, %c0_8, %c0_9], %29 {strides = array<i32>} : memref<1x1x128xf32, #tpu.memory_space<vmem>>, vector<1x1x128xf32>,
    %c1_i32_10 = arith.constant 1 : i32
    return
  }
  func.func @transform_0(%arg0: i32) -> (i32, i32, i32) {
    %c0_i32 = arith.constant 0 : i32
    %c0_i32_0 = arith.constant 0 : i32
    %c0_i32_1 = arith.constant 0 : i32
    %c0_i32_2 = arith.constant 0 : i32
    return %c0_i32, %c0_i32_0, %c0_i32_1 : i32, i32, i32
  }
  func.func @transform_1(%arg0: i32) -> (i32, i32) {
    %c0_i32 = arith.constant 0 : i32
    %c0_i32_0 = arith.constant 0 : i32
    %c0_i32_1 = arith.constant 0 : i32
    return %c0_i32, %c0_i32_0 : i32, i32
  }
  func.func @transform_2(%arg0: i32) -> (i32, i32, i32) {
    %c0_i32 = arith.constant 0 : i32
    %c0_i32_0 = arith.constant 0 : i32
    %c0_i32_1 = arith.constant 0 : i32
    %c0_i32_2 = arith.constant 0 : i32
    return %c0_i32, %c0_i32_0, %c0_i32_1 : i32, i32, i32
  }
}

</mosaic_0001>

<bundles_post_ra>
// kernel: tpu_custom_call.1
= control target key start
LH: loop header
LB: loop body
LE: loop exit
PB: predicated region body
PF: predicated region fallthrough
CT: control target
= control target key end

     0   :  { %7 = vsyncpa [#allocation3], 0  ;;  %s237_s0 = inlined_call_operand.hbm [shape: f32[1,1,128], index: 0, kind: input, shape index: {}]   ;;  %s238_s1 = inlined_call_operand.hbm [shape: f32[32,128], index: 1, kind: input, shape index: {}]   ;;  %s239_s2 = inlined_call_operand.hbm [shape: f32[1,1,128], index: 2, kind: output, shape index: {}]  }
   0x1   :  { %8 = vsyncpa [#allocation6], 0 }
   0x2   :  { %9 = vsyncpa [#allocation4], 0  ;;  %s174_s9 = smov [#allocation2]   ;;  %s175_s11 = smov [#allocation5]  }
   0x3   :  { %s16_s10 = sshll.u32 %s174_s9, 4  ;;  %s25_s12 = sshll.u32 %s175_s11, 4  ;;  %s17_s10 = int_to_ptr.vmem [resolvable:$true] %s16_s10  ;;  %s194_s12 = int_to_ptr.vmem [resolvable:$true] %s25_s12 }
   0x4   :  { %s102_s15 = scalar_lea.hbm %s237_s0, 16 }
   0x5   :  { %p103_p0 = scmp.ne.s32.totalorder %s237_s0, %s102_s15  ;;  %p106_p1 = scmp.lt.u32.totalorder %s102_s15, %s237_s0 }
   0x7   :  { %p108_p2 = pnand %p106_p1, %p103_p0 }
   0x9   :  { %111 = shalt.err (!%p108_p2)
}
   0xa   :  { %s112_s20 = scalar_lea.vmem %s17_s10, 16  ;;  %s116_s21 = scalar_lea.vmem %s17_s10, 32 }
   0xb   :  { %p113_p3 = scmp.ne.s32.totalorder %s17_s10, %s112_s20  ;;  %p117_p4 = scmp.lt.s32.totalorder %s17_s10, %s17_s10 }
   0xc   :  { %p118_p5 = scmp.lt.s32.totalorder %s116_s21, %s112_s20 }
   0xe   :  { %p119_p6 = por %p118_p5, %p117_p4 }
  0x10   :  { %p120_p7 = pnand %p119_p6, %p113_p3 }
  0x12   :  { %123 = shalt.err (!%p120_p7)
}
  0x13   :  { %19 = dma.hbm_to_vmem [thread:$0]  %s237_s0, 16, %s17_s10, [#allocation3]  }
  0x14   :  { %s124_s26 = scalar_lea.hbm %s238_s1, 512 }
  0x15   :  { %p125_p8 = scmp.ne.s32.totalorder %s238_s1, %s124_s26  ;;  %p128_p9 = scmp.lt.u32.totalorder %s124_s26, %s238_s1 }
  0x17   :  { %p130_p10 = pnand %p128_p9, %p125_p8 }
  0x19   :  { %133 = shalt.err (!%p130_p10)
}
  0x1a   :  { %s134_s3 = scalar_lea.vmem %s194_s12, 512  ;;  %p139_p12 = scmp.lt.s32.totalorder %s194_s12, %s194_s12 }
  0x1b   :  { %p135_p11 = scmp.ne.s32.totalorder %s194_s12, %s134_s3  ;;  %p140_p13 = scmp.lt.s32.totalorder %s134_s3, %s134_s3 }
  0x1d   :  { %p141_p0 = por %p140_p13, %p139_p12 }
  0x1f   :  { %p142_p1 = pnand %p141_p0, %p135_p11 }
  0x21   :  { %145 = shalt.err (!%p142_p1)
}
  0x22   :  { %s176_s0 = smov 128   ;;  %s177_s4 = smov 8  }
  0x23   :  { %31 = dma.hbm_to_vmem [thread:$0]  %s238_s1, 512, %s194_s12, [#allocation6], %s176_s0, %s176_s0, %s177_s4  }
  0x24   :  { %168 = dma.done.wait [#allocation3], 16  }
  0x25   :  { %169 = vsyncadd [#allocation3], 4294967280 }
  0x26   :  { %170 = dma.done.wait [#allocation6], 512  }
  0x27   :  { %171 = vsyncadd [#allocation6], 4294966784  ;;  %v38_v0 = vlaneseq  ;;  %v43_v1 = vld [vmem:[#allocation2] sm:$0x1]  ;;  %v50_v11 = vld [vmem:[#allocation5] sm:$0xff]  ;;  %s178_s1 = smov [#allocation7]  }
  0x28   :  { %v44_v3 = vmul.f32 16.0, %v43_v1  ;;  %v51_v12 = vld [vmem:[#allocation5 + $0x8] sm:$0xff]  ;;  %v52_v13 = vld [vmem:[#allocation5 + $0x10] sm:$0xff]  ;;  %v53_v15 = vld [vmem:[#allocation5 + $0x18] sm:$0xff]  ;;  %s84_s7 = sshll.u32 %s178_s1, 4  ;;  %s85_s7 = int_to_ptr.vmem [resolvable:$true] %s84_s7 }
  0x29   :  { %v39_v2 = vshrl.u32 %v38_v0, 7  ;;  %s146_s8 = scalar_lea.vmem %s85_s7, 16  ;;  %s150_s9 = scalar_lea.vmem %s85_s7, 32 }
  0x2a   :  { %v96_v4 = vcvt.f32.s32 %v44_v3  ;;  %p147_p2 = scmp.ne.s32.totalorder %s85_s7, %s146_s8  ;;  %p151_p3 = scmp.lt.s32.totalorder %s85_s7, %s85_s7 }
  0x2b   :  { %v58_v5 = vsub.s32 0, %v39_v2  ;;  %v40_v7 = vadd.s32 8, %v39_v2  ;;  %v41_v8 = vadd.s32 16, %v39_v2  ;;  %v42_v9 = vadd.s32 24, %v39_v2  ;;  %p152_p4 = scmp.lt.s32.totalorder %s150_s9, %s146_s8 }
  0x2c   :  { %vm46_vm0 = vcmp.gt.s32.totalorder %v96_v4, 0 }
  0x2d   :  { %v47_v6 = vsel %vm46_vm0, %v96_v4, 0  ;;  %p153_p5 = por %p152_p4, %p151_p3 }
  0x2e   :  { %vm48_vm1 = vcmp.lt.s32.totalorder %v47_v6, 16 }
  0x2f   :  { %v49_v10 = vsel %vm48_vm1, %v47_v6, 16  ;;  %p154_p6 = pnand %p153_p5, %p147_p2 }
  0x30   :  { %v59_v14 = vrot.slane %v49_v10, %v58_v5 }
  0x32   :  { %vm60_vm2 = vcmp.eq.s32.totalorder %v39_v2, %v59_v14  ;;  %vm61_vm3 = vcmp.eq.s32.totalorder %v40_v7, %v59_v14  ;;  %vm62_vm4 = vcmp.eq.s32.totalorder %v41_v8, %v59_v14  ;;  %vm63_vm5 = vcmp.eq.s32.totalorder %v42_v9, %v59_v14 }
  0x33   :  { %v64_v16 = vsel %vm60_vm2, %v50_v11, 0.0  ;;  %v65_v17 = vsel %vm61_vm3, %v51_v12, 0.0  ;;  %v66_v18 = vsel %vm62_vm4, %v52_v13, 0.0  ;;  %v67_v20 = vsel %vm63_vm5, %v53_v15, 0.0 }
  0x34   :  { %v68_v19 = vadd.f32 %v65_v17, %v64_v16 }
  0x36   :  { %v69_v21 = vadd.f32 %v68_v19, %v66_v18 }
  0x38   :  { %v70_v22 = vadd.f32 %v69_v21, %v67_v20 }
  0x3a   :  { %v71_v23 = vrot.slane %v70_v22, 4 }
  0x3c   :  { %v72_v24 = vadd.f32 %v71_v23, %v70_v22 }
  0x3e   :  { %v73_v25 = vrot.slane %v72_v24, 2 }
  0x40   :  { %v74_v26 = vadd.f32 %v73_v25, %v72_v24 }
  0x42   :  { %v75_v27 = vrot.slane %v74_v26, 1 }
  0x44   :  { %v76_v28 = vadd.f32 %v75_v27, %v74_v26 }
  0x46   :  { %77 = vst [vmem:[#allocation7] sm:$0x1] %v76_v28 }
  0x47   :  { %157 = shalt.err (!%p154_p6)
}
  0x48   :  { %s158_s12 = scalar_lea.hbm %s239_s2, 16 }
  0x49   :  { %p159_p7 = scmp.ne.s32.totalorder %s239_s2, %s158_s12  ;;  %p162_p8 = scmp.lt.u32.totalorder %s158_s12, %s239_s2 }
  0x4b   :  { %p164_p9 = pnand %p162_p8, %p159_p7 }
  0x4d   :  { %167 = shalt.err (!%p164_p9)
}
  0x4e   :  { %87 = dma.vmem_to_hbm [thread:$0]  %s85_s7, 16, %s239_s2, [#allocation4]  }
  0x4f   :  { %172 = dma.done.wait [#allocation4], 16  }
  0x50   :  { %173 = vsyncadd [#allocation4], 4294967280 }
  0x51   :  { %91 = vsyncpa [#allocation3], 1 }
  0x52   :  { %92 = vsyncpa [#allocation6], 1 }
  0x53   :  { %93 = vsyncpa [#allocation4], 1 }

</bundles_post_ra>
